<compile_context>
chip_gen: v7x
topology: tpu7x:2x2x1
jax: 0.10.0
libtpu: 0.0.40
codegen_flags: <defaults>
</compile_context>

<pallas_src>
import functools

import jax
import jax.numpy as jnp
import numpy as np
from jax.experimental import pallas as pl
from jax.experimental.pallas import tpu as pltpu


# ---------------------------------------------------------------------------
# Block-size helpers
# ---------------------------------------------------------------------------

def _largest_divisor_leq(n, cap):
    cap = max(1, min(n, cap))
    for d in range(cap, 0, -1):
        if n % d == 0:
            return d
    return 1


def _pick_block(n, cap, align):
    """Largest divisor of n that is <= cap and a multiple of `align`.
    Falls back to the full dimension (always a legal Mosaic block)."""
    if n <= cap:
        return n
    for d in range(cap, 0, -1):
        if n % d == 0 and d % align == 0:
            return d
    return n


def _shrink(n, current, align):
    """Largest divisor of n that is strictly < current and a multiple of `align`;
    returns `current` unchanged if none exists."""
    for d in range(min(current - 1, n), align - 1, -1):
        if n % d == 0 and d % align == 0:
            return d
    return current


# ---------------------------------------------------------------------------
# Stage 1: linear projection kernel  (x @ W^T, batch collapsed into M)
# ---------------------------------------------------------------------------

def _linear_kernel(x_ref, w_ref, o_ref):
    o_ref[...] = jax.lax.dot_general(
        x_ref[...], w_ref[...], (((1,), (0,)), ((), ())),
        preferred_element_type=jnp.float32).astype(o_ref.dtype)


def _linear_pallas(x2, w_t, *, out_dtype, block_m_cap=256):
    """x2: (M, K) ; w_t: (K, N) pre-transposed weight ; returns (M, N)."""
    M, K = x2.shape
    _, N = w_t.shape
    sub_align = 8 if x2.dtype.itemsize >= 4 else 16
    block_m = _pick_block(M, block_m_cap, sub_align)
    # Keep the weight slab around <= 8 MiB; N is a multiple of 128 by construction.
    bn_cap = max(128, (8 << 20) // max(1, K * w_t.dtype.itemsize))
    block_n = _pick_block(N, min(N, bn_cap), 128)
    grid = (M // block_m, N // block_n)

    est = 2 * (block_m * K * x2.dtype.itemsize
               + K * block_n * w_t.dtype.itemsize
               + block_m * block_n * jnp.dtype(out_dtype).itemsize)
    vmem_limit = int(min(max(est * 1.25 + (2 << 20), 32 << 20), 120 << 20))

    return pl.pallas_call(
        _linear_kernel,
        out_shape=jax.ShapeDtypeStruct((M, N), out_dtype),
        grid_spec=pltpu.PrefetchScalarGridSpec(
            num_scalar_prefetch=0,
            grid=grid,
            in_specs=[
                pl.BlockSpec((block_m, K), lambda m, n: (m, 0)),
                pl.BlockSpec((K, block_n), lambda m, n: (0, n)),
            ],
            out_specs=pl.BlockSpec((block_m, block_n), lambda m, n: (m, n)),
        ),
        compiler_params=pltpu.CompilerParams(
            dimension_semantics=("parallel", "parallel"),
            vmem_limit_bytes=vmem_limit),
    )(x2, w_t)


# ---------------------------------------------------------------------------
# Stage 2: flash-attention kernel over pre-projected q / k / v
# ---------------------------------------------------------------------------

def _flash_attention_kernel(*refs, has_mask):
    if has_mask:
        q_ref, k_ref, v_ref, bias_ref, o_ref, m_ref, l_ref, acc_ref = refs
    else:
        q_ref, k_ref, v_ref, o_ref, m_ref, l_ref, acc_ref = refs
        bias_ref = None

    kv = pl.program_id(2)
    cdt = q_ref.dtype          # MXU operand dtype (bf16 or f32); softmax stays f32.

    @pl.when(kv == 0)
    def _init():
        m_ref[...] = jnp.full(m_ref.shape, -jnp.inf, dtype=m_ref.dtype)
        l_ref[...] = jnp.zeros(l_ref.shape, dtype=l_ref.dtype)
        acc_ref[...] = jnp.zeros(acc_ref.shape, dtype=acc_ref.dtype)

    # score[b, q, k] = sum_h qp[b,q,h] * kp[b,k,h]   (batched contraction, no transpose)
    s = jax.lax.dot_general(
        q_ref[...], k_ref[...], (((2,), (2,)), ((0,), (0,))),
        preferred_element_type=jnp.float32)            # (Bb, Tq, Tk) f32

    if has_mask:
        # Additive bias prepared in the wrapper: 0 where kept, -99999 where masked.
        s = s + bias_ref[...]

    # Online softmax update (all f32 on the VPU/EUP).
    m_prev = m_ref[...]
    m_new = jnp.maximum(m_prev, jnp.max(s, axis=-1, keepdims=True))
    alpha = jnp.exp(m_prev - m_new)
    p = jnp.exp(s - m_new)
    l_ref[...] = alpha * l_ref[...] + jnp.sum(p, axis=-1, keepdims=True)
    acc_ref[...] = alpha * acc_ref[...] + jax.lax.dot_general(
        p.astype(cdt), v_ref[...], (((2,), (1,)), ((0,), (0,))),
        preferred_element_type=jnp.float32)
    m_ref[...] = m_new

    @pl.when(kv == pl.num_programs(2) - 1)
    def _finalize():
        inv_l = pl.reciprocal(l_ref[...], approx=True)   # EUP vrcp, effectively free
        o_ref[...] = (acc_ref[...] * inv_l).astype(o_ref.dtype)


# ---------------------------------------------------------------------------
# Wrapper
# ---------------------------------------------------------------------------

def attention_pallas(query, key, value, wq, wk, wv, mask=None, *,
                     mxu_dtype=jnp.bfloat16, block_q_cap=256, block_k_cap=512):
    """query: (B, Lq, H); key/value: (B, Lk, H); wq/wk/wv: (H, H) torch layout (out,in);
    mask: (B, Lk) with 1 = keep, 0 = masked, or None.

    mxu_dtype defaults to bfloat16 (bf16-native MXU on v5e/v6e/v7x); softmax math and
    matmul accumulation remain f32.  Pass mxu_dtype=jnp.float32 for an exact f32 path.
    """
    B, Lq, H = query.shape
    _, Lk, _ = key.shape
    out_dtype = query.dtype
    cdt = jnp.dtype(mxu_dtype) if mxu_dtype is not None else jnp.dtype(query.dtype)
    csize = cdt.itemsize
    osize = jnp.dtype(out_dtype).itemsize

    # Pad the hidden dim to a lane-dense multiple of 128.  Padded weight rows/cols and
    # activation channels are zero, so results in the first H channels are unchanged.
    Hp = max(128, ((H + 127) // 128) * 128)
    pad = Hp - H

    def prep_w(w):
        wt = jnp.asarray(w).T.astype(cdt)                 # (in, out)
        if pad:
            wt = jnp.pad(wt, ((0, pad), (0, pad)))
        return wt

    def prep_x(x):
        x = jnp.asarray(x).astype(cdt)
        if pad:
            x = jnp.pad(x, ((0, 0), (0, 0), (0, pad)))
        return x

    wq_t, wk_t, wv_t = prep_w(wq), prep_w(wk), prep_w(wv)
    q_in, k_in, v_in = prep_x(query), prep_x(key), prep_x(value)

    # ---- Stage 1: projections, computed exactly once (no re-projection per q block),
    # with batch collapsed into the matmul M dimension.
    qp = _linear_pallas(q_in.reshape(B * Lq, Hp), wq_t, out_dtype=cdt).reshape(B, Lq, Hp)
    kp = _linear_pallas(k_in.reshape(B * Lk, Hp), wk_t, out_dtype=cdt).reshape(B, Lk, Hp)
    vp = _linear_pallas(v_in.reshape(B * Lk, Hp), wv_t, out_dtype=cdt).reshape(B, Lk, Hp)

    has_mask = mask is not None
    if has_mask:
        bias = jnp.where(jnp.asarray(mask).reshape(B, 1, Lk) == 0,
                         jnp.float32(-99999.0), jnp.float32(0.0))

    # ---- Stage 2: flash attention over the projected tensors.
    sub_align = 8 if csize >= 4 else 16
    block_q = _pick_block(Lq, block_q_cap, sub_align)
    block_k = _pick_block(Lk, block_k_cap, 128)
    nq = Lq // block_q

    # Fold batches when the q tile is small (amortizes per-step grid overhead), but keep
    # the parallel grid extent >= 2 so both TensorCores stay busy on dual-TC chips.
    fold_cap = max(1, 256 // block_q)
    if nq < 2:
        fold_cap = min(fold_cap, max(1, B // 2))
    block_b = _largest_divisor_leq(B, fold_cap)

    def est_bytes(bb, bq, bk):
        qb = bb * bq * Hp * csize
        kb = bb * bk * Hp * csize           # k block (v block is identical)
        ob = bb * bq * Hp * osize
        mb = bb * bk * 4 if has_mask else 0
        scratch = bb * bq * (Hp + 2) * 4    # acc + m + l (f32)
        return 2 * (qb + 2 * kb + ob + mb) + scratch

    budget = 40 << 20   # fits inside v7x's 64 MiB physical VMEM with headroom
    while est_bytes(block_b, block_q, block_k) > budget:
        new_k = _shrink(Lk, block_k, 128)
        if new_k < block_k:
            block_k = new_k
            continue
        new_q = _shrink(Lq, block_q, sub_align)
        if new_q < block_q:
            block_q = new_q
            continue
        if block_b > 1:
            block_b = _largest_divisor_leq(B, block_b // 2)
            continue
        break

    nb, nq, nk = B // block_b, Lq // block_q, Lk // block_k
    est = est_bytes(block_b, block_q, block_k)
    vmem_limit = int(min(max(est * 1.25 + (2 << 20), 32 << 20), 120 << 20))

    in_specs = [
        pl.BlockSpec((block_b, block_q, Hp), lambda b, q, k: (b, q, 0)),   # projected q
        pl.BlockSpec((block_b, block_k, Hp), lambda b, q, k: (b, k, 0)),   # projected k
        pl.BlockSpec((block_b, block_k, Hp), lambda b, q, k: (b, k, 0)),   # projected v
    ]
    inputs = [qp, kp, vp]
    if has_mask:
        in_specs.append(pl.BlockSpec((block_b, 1, block_k), lambda b, q, k: (b, 0, k)))
        inputs.append(bias)

    grid_spec = pltpu.PrefetchScalarGridSpec(
        num_scalar_prefetch=0,
        grid=(nb, nq, nk),
        in_specs=in_specs,
        out_specs=pl.BlockSpec((block_b, block_q, Hp), lambda b, q, k: (b, q, 0)),
        scratch_shapes=[
            pltpu.VMEM((block_b, block_q, 1), jnp.float32),    # running max
            pltpu.VMEM((block_b, block_q, 1), jnp.float32),    # running sum
            pltpu.VMEM((block_b, block_q, Hp), jnp.float32),   # output accumulator
        ],
    )

    out = pl.pallas_call(
        functools.partial(_flash_attention_kernel, has_mask=has_mask),
        out_shape=jax.ShapeDtypeStruct((B, Lq, Hp), out_dtype),
        grid_spec=grid_spec,
        compiler_params=pltpu.CompilerParams(
            dimension_semantics=("parallel", "parallel", "arbitrary"),
            vmem_limit_bytes=vmem_limit),
    )(*inputs)

    if pad:
        out = out[..., :H]
    return out


def attention_ref(query, key, value, wq, wk, wv, mask=None):
    """Pure-JAX reference mirroring the PyTorch forward."""
    q = query @ wq.T
    k = key @ wk.T
    v = value @ wv.T
    score = jnp.einsum("bqh,bkh->bqk", q, k)
    if mask is not None:
        m = mask[:, None, :]
        score = jnp.where(m == 0, -99999.0, score)
    attn = jax.nn.softmax(score, axis=-1)
    return jnp.einsum("bqk,bkh->bqh", attn, v)


if __name__ == "__main__":
    def make_inputs(seed, B, Lq, Lk, H):
        ks = jax.random.split(jax.random.PRNGKey(seed), 7)
        query = jax.random.normal(ks[0], (B, Lq, H), dtype=jnp.float32)
        key_t = jax.random.normal(ks[1], (B, Lk, H), dtype=jnp.float32)
        value = jax.random.normal(ks[2], (B, Lk, H), dtype=jnp.float32)
        bound = 1.0 / np.sqrt(H)  # torch nn.Linear default init range
        wq = jax.random.uniform(ks[3], (H, H), minval=-bound, maxval=bound, dtype=jnp.float32)
        wk = jax.random.uniform(ks[4], (H, H), minval=-bound, maxval=bound, dtype=jnp.float32)
        wv = jax.random.uniform(ks[5], (H, H), minval=-bound, maxval=bound, dtype=jnp.float32)
        mask = (jax.random.uniform(ks[6], (B, Lk)) > 0.3).astype(jnp.float32)
        mask = mask.at[:, 0].set(1.0)   # guarantee at least one kept key per row
        return query, key_t, value, wq, wk, wv, mask

    to_bf = lambda x: x.astype(jnp.bfloat16).astype(jnp.float32)

    # 1) Small shapes implied by the module (batch=2, seq=8, hidden=32), exact f32 path.
    q, kt, v, wq, wk, wv, mask = make_inputs(0, 2, 8, 8, 32)
    out = jax.block_until_ready(
        attention_pallas(q, kt, v, wq, wk, wv, mask, mxu_dtype=jnp.float32))
    ref = attention_ref(q, kt, v, wq, wk, wv, mask)
    assert np.allclose(np.asarray(out), np.asarray(ref), atol=2e-2, rtol=2e-2), \
        "f32 small-shape output does not match reference"

    # 2) mask=None specialized path, default bf16 MXU operands.
    out_nm = jax.block_until_ready(attention_pallas(q, kt, v, wq, wk, wv, None))
    ref_nm = attention_ref(to_bf(q), to_bf(kt), to_bf(v),
                           to_bf(wq), to_bf(wk), to_bf(wv), None)
    diff_nm = float(np.max(np.abs(np.asarray(out_nm) - np.asarray(ref_nm))))
    assert diff_nm < 0.08, f"mask=None bf16 output deviates too much (max abs diff {diff_nm})"

    # 3) Multi-block flash path (2 q-blocks x 2 k-blocks), default bf16 MXU operands;
    #    compare against a bf16-rounded-input f32 reference so only in-kernel bf16
    #    intermediates contribute to the diff.
    q2, kt2, v2, wq2, wk2, wv2, mask2 = make_inputs(1, 2, 256, 256, 128)
    out2 = jax.block_until_ready(
        attention_pallas(q2, kt2, v2, wq2, wk2, wv2, mask2,
                         block_q_cap=128, block_k_cap=128))
    ref2 = attention_ref(to_bf(q2), to_bf(kt2), to_bf(v2),
                         to_bf(wq2), to_bf(wk2), to_bf(wv2), mask2)
    diff2 = float(np.max(np.abs(np.asarray(out2) - np.asarray(ref2))))
    assert diff2 < 0.1, f"bf16 flash (multi-block) output deviates too much (max abs diff {diff2})"

    print("KERNEL_OK")
</pallas_src>

<mosaic_0001>
module attributes {stable_mosaic.version = 11 : i64} {
  func.func @_linear_kernel(%arg0: i32, %arg1: i32, %arg2: memref<16x128xf32, #tpu.memory_space<vmem>>, %arg3: memref<128x128xf32, #tpu.memory_space<vmem>>, %arg4: memref<16x128xf32, #tpu.memory_space<vmem>>) attributes {dimension_semantics = [#tpu.dimension_semantics<parallel>, #tpu.dimension_semantics<parallel>], iteration_bounds = array<i64: 1, 1>, scalar_prefetch = 0 : i64, scratch_operands = 0 : i64, tpu.core_type = #tpu.core_type<tc>, window_params = [{transform_indices = @transform_0, window_bounds = array<i64: 16, 128>}, {transform_indices = @transform_1, window_bounds = array<i64: 128, 128>}, {transform_indices = @transform_2, window_bounds = array<i64: 16, 128>}]} {
    %c0 = arith.constant 0 : index
    %c0_0 = arith.constant 0 : index
    %0 = vector.load %arg2[%c0, %c0_0] : memref<16x128xf32, #tpu.memory_space<vmem>>, vector<16x128xf32>
    %c0_1 = arith.constant 0 : index
    %c0_2 = arith.constant 0 : index
    %1 = vector.load %arg3[%c0_1, %c0_2] : memref<128x128xf32, #tpu.memory_space<vmem>>, vector<128x128xf32>
    %cst = arith.constant dense<0.000000e+00> : vector<16x128xf32>
    %2 = tpu.matmul %0, %1, %cst {dimension_numbers = #tpu.dot_dimension_numbers<[1], [0], [0], [1], [0, 0, 1, 1], [], []>} : vector<16x128xf32>, vector<128x128xf32>, vector<16x128xf32> -> vector<16x128xf32>
    %c0_3 = arith.constant 0 : index
    %c0_4 = arith.constant 0 : index
    %3 = vector.load %arg4[%c0_3, %c0_4] : memref<16x128xf32, #tpu.memory_space<vmem>>, vector<16x128xf32>
    tpu.vector_store %arg4[%c0_3, %c0_4], %2 {strides = array<i32>} : memref<16x128xf32, #tpu.memory_space<vmem>>, vector<16x128xf32>,
    return
  }
  func.func @transform_0(%arg0: i32, %arg1: i32) -> (i32, i32) {
    %c0_i32 = arith.constant 0 : i32
    %c0_i32_0 = arith.constant 0 : i32
    return %arg0, %c0_i32 : i32, i32
  }
  func.func @transform_1(%arg0: i32, %arg1: i32) -> (i32, i32) {
    %c0_i32 = arith.constant 0 : i32
    %c0_i32_0 = arith.constant 0 : i32
    return %c0_i32, %arg1 : i32, i32
  }
  func.func @transform_2(%arg0: i32, %arg1: i32) -> (i32, i32) {
    %c0_i32 = arith.constant 0 : i32
    return %arg0, %arg1 : i32, i32
  }
}

</mosaic_0001>

<bundles_post_ra>
// kernel: tpu_custom_call.1
= control target key start
LH: loop header
LB: loop body
LE: loop exit
PB: predicated region body
PF: predicated region fallthrough
CT: control target
= control target key end

     0   :  { %7 = vsyncpa [#allocation3], 0  ;;  %s380_s0 = inlined_call_operand.hbm [shape: f32[16,128], index: 0, kind: input, shape index: {}]   ;;  %s381_s1 = inlined_call_operand.hbm [shape: f32[128,128], index: 1, kind: input, shape index: {}]   ;;  %s382_s2 = inlined_call_operand.hbm [shape: f32[16,128], index: 2, kind: output, shape index: {}]  }
   0x1   :  { %8 = vsyncpa [#allocation6], 0 }
   0x2   :  { %9 = vsyncpa [#allocation4], 0  ;;  %s315_s9 = smov [#allocation2]   ;;  %s243_s13 = scalar_lea.hbm %s380_s0, 256 }
   0x3   :  { %s15_s10 = sshll.u32 %s315_s9, 4  ;;  %p244_p0 = scmp.ne.s32.totalorder %s380_s0, %s243_s13  ;;  %s16_s10 = int_to_ptr.vmem [resolvable:$true] %s15_s10 }
   0x4   :  { %p247_p1 = scmp.lt.u32.totalorder %s243_s13, %s380_s0 }
   0x6   :  { %p249_p2 = pnand %p247_p1, %p244_p0 }
   0x8   :  { %252 = shalt.err (!%p249_p2)
}
   0x9   :  { %s253_s18 = scalar_lea.vmem %s16_s10, 256  ;;  %p258_p4 = scmp.lt.s32.totalorder %s16_s10, %s16_s10 }
   0xa   :  { %p254_p3 = scmp.ne.s32.totalorder %s16_s10, %s253_s18  ;;  %p259_p5 = scmp.lt.s32.totalorder %s253_s18, %s253_s18 }
   0xc   :  { %p260_p6 = por %p259_p5, %p258_p4 }
   0xe   :  { %p261_p7 = pnand %p260_p6, %p254_p3 }
  0x10   :  { %264 = shalt.err (!%p261_p7)
}
  0x11   :  { %s316_s19 = smov 128   ;;  %s317_s20 = smov 8  }
  0x12   :  { %21 = dma.hbm_to_vmem [thread:$0]  %s380_s0, 256, %s16_s10, [#allocation3], %s316_s19, %s316_s19, %s317_s20  }
  0x13   :  { %s318_s23 = smov [#allocation5]   ;;  %s265_s27 = scalar_lea.hbm %s381_s1, 2048 }
  0x14   :  { %s27_s24 = sshll.u32 %s318_s23, 4  ;;  %p266_p8 = scmp.ne.s32.totalorder %s381_s1, %s265_s27  ;;  %s28_s24 = int_to_ptr.vmem [resolvable:$true] %s27_s24 }
  0x15   :  { %p269_p9 = scmp.lt.u32.totalorder %s265_s27, %s381_s1 }
  0x17   :  { %p271_p10 = pnand %p269_p9, %p266_p8 }
  0x19   :  { %274 = shalt.err (!%p271_p10)
}
  0x1a   :  { %s275_s4 = scalar_lea.vmem %s28_s24, 2048  ;;  %p280_p12 = scmp.lt.s32.totalorder %s28_s24, %s28_s24 }
  0x1b   :  { %p276_p11 = scmp.ne.s32.totalorder %s28_s24, %s275_s4  ;;  %p281_p13 = scmp.lt.s32.totalorder %s275_s4, %s275_s4 }
  0x1d   :  { %p282_p0 = por %p281_p13, %p280_p12 }
  0x1f   :  { %p283_p1 = pnand %p282_p0, %p276_p11 }
  0x21   :  { %286 = shalt.err (!%p283_p1)
}
  0x22   :  { %33 = dma.hbm_to_vmem [thread:$0]  %s381_s1, 2048, %s28_s24, [#allocation6], %s316_s19, %s316_s19, %s317_s20  }
  0x23   :  { %309 = dma.done.wait [#allocation3], 256  }
  0x24   :  { %310 = vsyncadd [#allocation3], 4294967040 }
  0x25   :  { %311 = dma.done.wait [#allocation6], 2048  }
  0x26   :  { %312 = vsyncadd [#allocation6], 4294965248  ;;  %v42_v0 = vld [vmem:[#allocation5] sm:$0xff]  ;;  %v43_v1 = vld [vmem:[#allocation5 + $0x8] sm:$0xff]  ;;  %s319_s1 = smov [#allocation7]  }
  0x27   :  { %v44_v2 = vld [vmem:[#allocation5 + $0x10] sm:$0xff]  ;;  %v206_v3 = vpack.c.bf16 %v43_v1, %v42_v0  ;;  %v45_v4 = vld [vmem:[#allocation5 + $0x18] sm:$0xff]  ;;  %v46_v6 = vld [vmem:[#allocation5 + $0x20] sm:$0xff]  ;;  %s140_s6 = sshll.u32 %s319_s1, 4  ;;  %s141_s6 = int_to_ptr.vmem [resolvable:$true] %s140_s6 }
  0x28   :  { %v210_v5 = vpack.c.bf16 %v45_v4, %v44_v2  ;;  %v47_v7 = vld [vmem:[#allocation5 + $0x28] sm:$0xff]  ;;  %v40_v9 = vld [vmem:[#allocation2] sm:$0xff]  ;;  %v49_v11 = vld [vmem:[#allocation5 + $0x38] sm:$0xff]  ;;  %s287_s7 = scalar_lea.vmem %s141_s6, 256  ;;  %p292_p3 = scmp.lt.s32.totalorder %s141_s6, %s141_s6 }
  0x29   :  { %207 = vmatprep.subr.bf16.mxu0 %v206_v3  ;;  %v214_v8 = vpack.c.bf16 %v47_v7, %v46_v6  ;;  %v48_v10 = vld [vmem:[#allocation5 + $0x30] sm:$0xff]  ;;  %203 = vmatprep.mubr.f32.mxu0 %v40_v9  ;;  %v50_v13 = vld [vmem:[#allocation5 + $0x40] sm:$0xff]  ;;  %v51_v14 = vld [vmem:[#allocation5 + $0x48] sm:$0xff]  ;;  %p288_p2 = scmp.ne.s32.totalorder %s141_s6, %s287_s7  ;;  %p293_p4 = scmp.lt.s32.totalorder %s287_s7, %s287_s7 }
  0x2a   :  { %209 = vmatpush3.bf16.msra.mxu0 %v206_v3  ;;  %v218_v12 = vpack.c.bf16 %v49_v11, %v48_v10  ;;  %v222_v15 = vpack.c.bf16 %v51_v14, %v50_v13  ;;  %v52_v16 = vld [vmem:[#allocation5 + $0x50] sm:$0xff]  ;;  %v53_v17 = vld [vmem:[#allocation5 + $0x58] sm:$0xff]  ;;  %v54_v19 = vld [vmem:[#allocation5 + $0x60] sm:$0xff] }
  0x2b   :  { %211 = vmatprep.subr.bf16.mxu0 %v210_v5  ;;  %v226_v18 = vpack.c.bf16 %v53_v17, %v52_v16  ;;  %v55_v20 = vld [vmem:[#allocation5 + $0x68] sm:$0xff]  ;;  %v56_v22 = vld [vmem:[#allocation5 + $0x70] sm:$0xff]  ;;  %v57_v23 = vld [vmem:[#allocation5 + $0x78] sm:$0xff]  ;;  %p294_p5 = por %p293_p4, %p292_p3 }
  0x2c   :  { %v230_v21 = vpack.c.bf16 %v55_v20, %v54_v19  ;;  %v234_v24 = vpack.c.bf16 %v57_v23, %v56_v22  ;;  %v41_v25 = vld [vmem:[#allocation2 + $0x8] sm:$0xff] }
  0x2d   :  { %p295_p6 = pnand %p294_p5, %p288_p2 }
  0x2e   :  { %213 = vmatpush3.bf16.msra.mxu0 %v210_v5 }
  0x2f   :  { %215 = vmatprep.subr.bf16.mxu0 %v214_v8 }
  0x32   :  { %217 = vmatpush3.bf16.msra.mxu0 %v214_v8 }
  0x33   :  { %219 = vmatprep.subr.bf16.mxu0 %v218_v12 }
  0x36   :  { %221 = vmatpush3.bf16.msra.mxu0 %v218_v12 }
  0x37   :  { %223 = vmatprep.subr.bf16.mxu0 %v222_v15 }
  0x3a   :  { %225 = vmatpush3.bf16.msra.mxu0 %v222_v15 }
  0x3b   :  { %227 = vmatprep.subr.bf16.mxu0 %v226_v18 }
  0x3e   :  { %229 = vmatpush3.bf16.msra.mxu0 %v226_v18 }
  0x3f   :  { %231 = vmatprep.subr.bf16.mxu0 %v230_v21 }
  0x42   :  { %233 = vmatpush3.bf16.msra.mxu0 %v230_v21 }
  0x43   :  { %235 = vmatprep.subr.bf16.mxu0 %v234_v24 }
  0x46   :  { %237 = vmatpush3.bf16.msra.mxu0 %v234_v24 }
  0x49   :  { %204 = vmatmul.mubr.f32.vlgmr.msra.gmra.mrb[0].mxu0 %v41_v25 }
 0x11c   :  { %v205_v26 = vpop.f32.mrb[0].mxu0 }
 0x11d   :  { %134 = vst [vmem:[#allocation7 + $0x8] sm:$0xff] %v205_v26  ;;  %v124_v27 = vpop.f32.mrb[1].mxu0 }
 0x11e   :  { %133 = vst [vmem:[#allocation7] sm:$0xff] %v124_v27 }
 0x11f   :  { %298 = shalt.err (!%p295_p6)
}
 0x120   :  { %s299_s10 = scalar_lea.hbm %s382_s2, 256 }
 0x121   :  { %p300_p7 = scmp.ne.s32.totalorder %s382_s2, %s299_s10  ;;  %p303_p8 = scmp.lt.u32.totalorder %s299_s10, %s382_s2 }
 0x123   :  { %p305_p9 = pnand %p303_p8, %p300_p7 }
 0x125   :  { %308 = shalt.err (!%p305_p9)
}
 0x126   :  { %146 = dma.vmem_to_hbm [thread:$0]  %s141_s6, 256, %s382_s2, [#allocation4], %s316_s19, %s316_s19, %s317_s20  }
 0x127   :  { %313 = dma.done.wait [#allocation4], 256  }
 0x128   :  { %314 = vsyncadd [#allocation4], 4294967040 }
 0x129   :  { %150 = vsyncpa [#allocation3], 1 }
 0x12a   :  { %151 = vsyncpa [#allocation6], 1 }
 0x12b   :  { %152 = vsyncpa [#allocation4], 1 }

</bundles_post_ra>
